<compile_context>
chip_gen: v5e
topology: v5e:2x2
jax: 0.10.0
libtpu: 0.0.40
codegen_flags: <defaults>
</compile_context>

<pallas_src>
import jax
import jax.numpy as jnp
from jax.experimental import pallas as pl
from jax.experimental.pallas import tpu as pltpu

LANES = 128
MAX_TILE_ROWS = 2048   # (2048,128) f32 tile = 1 MiB; 2 inputs x 2 buffers = 4 MiB VMEM (fits v7x too)
NCORES = 2             # leading 'parallel' grid axis -> both TCs on v7x; no-op on v5e/v6e
PAD_LOGIT = -100.0     # bce/focal loss of (logit=-100, target=0) is exactly 0 -> no mask needed


def _focal_loss_kernel(x_ref, t_ref, out_ref, acc_ref):
    step = pl.program_id(1)

    @pl.when(step == 0)
    def _():
        acc_ref[...] = jnp.zeros_like(acc_ref)

    x = x_ref[...].astype(jnp.float32)
    t = t_ref[...].astype(jnp.float32)

    # e = exp(-|x|) reused for both the stable BCE-with-logits and the sigmoid.
    e = jnp.exp(-jnp.abs(x))
    ce = jnp.maximum(x, 0.0) - x * t + jnp.log1p(e)          # bce_with_logits, 'none'
    inv = 1.0 / (1.0 + e)
    p = jnp.where(x >= 0.0, inv, e * inv)                    # == sigmoid(x)
    p_t = p * t + (1.0 - p) * (1.0 - t)
    one_minus_pt = 1.0 - p_t
    loss = ce * one_minus_pt * one_minus_pt                  # gamma = 2

    # Per-lane partial sums (sublane reduce only); cross-lane reduce done outside.
    acc_ref[...] += jnp.sum(loss, axis=0, keepdims=True)

    @pl.when(step == pl.num_programs(1) - 1)
    def _():
        out_ref[...] = acc_ref[...].reshape(1, 1, LANES)


def focal_loss(inputs, targets, gamma=2, reduce="mean"):
    """Focal loss forward. inputs/targets: same shape (e.g. NCHW), any rank."""
    assert inputs.shape == targets.shape
    assert gamma == 2, "kernel hard-codes gamma=2 like the module default"
    n = inputs.size

    x = inputs.reshape(-1)
    t = targets.reshape(-1)
    if not jnp.issubdtype(x.dtype, jnp.floating):
        x = x.astype(jnp.float32)
    if t.dtype != x.dtype:
        t = t.astype(x.dtype)

    # Tiling: split rows across NCORES, up to MAX_TILE_ROWS rows per grid step.
    rows_needed = -(-n // LANES)
    per_core = -(-rows_needed // NCORES)
    tile_rows = min(MAX_TILE_ROWS, ((per_core + 7) // 8) * 8)
    steps = -(-per_core // tile_rows)
    rows_padded = NCORES * steps * tile_rows
    pad = rows_padded * LANES - n

    # Tail padding: logit PAD_LOGIT with target 0 contributes exactly 0 loss.
    x = jnp.pad(x, (0, pad), constant_values=PAD_LOGIT).reshape(rows_padded, LANES)
    t = jnp.pad(t, (0, pad)).reshape(rows_padded, LANES)

    def in_map(c, i):
        return (c * steps + i, 0)

    itemsize = x.dtype.itemsize
    cost = pl.CostEstimate(
        flops=14 * rows_padded * LANES,
        transcendentals=3 * rows_padded * LANES,
        bytes_accessed=2 * rows_padded * LANES * itemsize + NCORES * LANES * 4,
    )

    partials = pl.pallas_call(
        _focal_loss_kernel,
        out_shape=jax.ShapeDtypeStruct((NCORES, 1, LANES), jnp.float32),
        grid_spec=pltpu.PrefetchScalarGridSpec(
            num_scalar_prefetch=0,
            grid=(NCORES, steps),
            in_specs=[
                pl.BlockSpec((tile_rows, LANES), in_map),
                pl.BlockSpec((tile_rows, LANES), in_map),
            ],
            out_specs=pl.BlockSpec((1, 1, LANES), lambda c, i: (c, 0, 0)),
            scratch_shapes=[pltpu.VMEM((1, LANES), jnp.float32)],
        ),
        compiler_params=pltpu.CompilerParams(
            dimension_semantics=("parallel", "arbitrary"),
        ),
        cost_estimate=cost,
    )(x, t)

    total = jnp.sum(partials)
    if reduce == "sum":
        return total
    elif reduce == "mean":
        return total / jnp.float32(n)
    else:
        # TODO(synk): reduce='none' (full per-element loss tensor) is not implemented in this kernel.
        raise ValueError("reduce must be 'sum' or 'mean' for this kernel")


def _focal_loss_ref(inputs, targets, gamma=2):
    x = inputs.astype(jnp.float32)
    t = targets.astype(jnp.float32)
    p = jax.nn.sigmoid(x)
    ce = jnp.maximum(x, 0.0) - x * t + jnp.log1p(jnp.exp(-jnp.abs(x)))
    p_t = p * t + (1.0 - p) * (1.0 - t)
    loss = ce * (1.0 - p_t) ** gamma
    return jnp.mean(loss)


if __name__ == "__main__":
    key = jax.random.PRNGKey(0)
    k1, k2 = jax.random.split(key)
    # NCHW logits and binary targets, small shapes
    inputs = jax.random.normal(k1, (2, 4, 16, 16), dtype=jnp.float32) * 2.0
    targets = (jax.random.uniform(k2, (2, 4, 16, 16)) > 0.5).astype(jnp.float32)

    out = focal_loss(inputs, targets)
    out = jax.block_until_ready(out)

    ref = _focal_loss_ref(inputs, targets)
    assert jnp.allclose(out, ref, rtol=1e-5, atol=1e-6), (out, ref)
    print("KERNEL_OK")
</pallas_src>

<mosaic_0001>
module attributes {stable_mosaic.version = 11 : i64} {
  func.func @_focal_loss_kernel(%arg0: i32, %arg1: i32, %arg2: memref<8x128xf32, #tpu.memory_space<vmem>>, %arg3: memref<8x128xf32, #tpu.memory_space<vmem>>, %arg4: memref<1x1x128xf32, #tpu.memory_space<vmem>>, %arg5: memref<1x128xf32, #tpu.memory_space<vmem>>) attributes {dimension_semantics = [#tpu.dimension_semantics<parallel>, #tpu.dimension_semantics<arbitrary>], iteration_bounds = array<i64: 2, 1>, scalar_prefetch = 0 : i64, scratch_operands = 1 : i64, tpu.core_type = #tpu.core_type<tc>, window_params = [{transform_indices = @transform_0, window_bounds = array<i64: 8, 128>}, {transform_indices = @transform_1, window_bounds = array<i64: 8, 128>}, {transform_indices = @transform_2, window_bounds = array<i64: 1, 1, 128>}]} {
    %c0_i32 = arith.constant 0 : i32
    %0 = arith.cmpi eq, %arg1, %c0_i32 : i32
    %1 = arith.extui %0 : i1 to i32
    %c0_i32_0 = arith.constant 0 : i32
    %2 = arith.cmpi ne, %1, %c0_i32_0 : i32
    scf.if %2 {
      %cst_18 = arith.constant 0.000000e+00 : f32
      %42 = vector.broadcast %cst_18 : f32 to vector<1x128xf32>
      %c0_19 = arith.constant 0 : index
      %c0_20 = arith.constant 0 : index
      %43 = vector.load %arg5[%c0_19, %c0_20] : memref<1x128xf32, #tpu.memory_space<vmem>>, vector<1x128xf32>
      tpu.vector_store %arg5[%c0_19, %c0_20], %42 {strides = array<i32>} : memref<1x128xf32, #tpu.memory_space<vmem>>, vector<1x128xf32>,
    } else {
    }
    %c0 = arith.constant 0 : index
    %c0_1 = arith.constant 0 : index
    %3 = vector.load %arg2[%c0, %c0_1] : memref<8x128xf32, #tpu.memory_space<vmem>>, vector<8x128xf32>
    %c0_2 = arith.constant 0 : index
    %c0_3 = arith.constant 0 : index
    %4 = vector.load %arg3[%c0_2, %c0_3] : memref<8x128xf32, #tpu.memory_space<vmem>>, vector<8x128xf32>
    %5 = math.absf %3 : vector<8x128xf32>
    %cst = arith.constant 0.000000e+00 : f32
    %6 = vector.broadcast %cst : f32 to vector<8x128xf32>
    %7 = arith.subf %6, %5 : vector<8x128xf32>
    %8 = math.exp %7 : vector<8x128xf32>
    %cst_4 = arith.constant 0.000000e+00 : f32
    %9 = vector.broadcast %cst_4 : f32 to vector<8x128xf32>
    %10 = arith.maximumf %3, %9 : vector<8x128xf32>
    %11 = arith.mulf %3, %4 : vector<8x128xf32>
    %12 = arith.subf %10, %11 : vector<8x128xf32>
    %13 = math.log1p %8 : vector<8x128xf32>
    %14 = arith.addf %12, %13 : vector<8x128xf32>
    %cst_5 = arith.constant 1.000000e+00 : f32
    %15 = vector.broadcast %cst_5 : f32 to vector<8x128xf32>
    %16 = arith.addf %15, %8 : vector<8x128xf32>
    %cst_6 = arith.constant 1.000000e+00 : f32
    %17 = vector.broadcast %cst_6 : f32 to vector<8x128xf32>
    %18 = arith.divf %17, %16 : vector<8x128xf32>
    %cst_7 = arith.constant 0.000000e+00 : f32
    %19 = vector.broadcast %cst_7 : f32 to vector<8x128xf32>
    %20 = arith.cmpf oge, %3, %19 : vector<8x128xf32>
    %21 = arith.mulf %8, %18 : vector<8x128xf32>
    %22 = arith.select %20, %18, %21 : vector<8x128xi1>, vector<8x128xf32>
    %23 = arith.mulf %22, %4 : vector<8x128xf32>
    %cst_8 = arith.constant 1.000000e+00 : f32
    %24 = vector.broadcast %cst_8 : f32 to vector<8x128xf32>
    %25 = arith.subf %24, %22 : vector<8x128xf32>
    %cst_9 = arith.constant 1.000000e+00 : f32
    %26 = vector.broadcast %cst_9 : f32 to vector<8x128xf32>
    %27 = arith.subf %26, %4 : vector<8x128xf32>
    %28 = arith.mulf %25, %27 : vector<8x128xf32>
    %29 = arith.addf %23, %28 : vector<8x128xf32>
    %cst_10 = arith.constant 1.000000e+00 : f32
    %30 = vector.broadcast %cst_10 : f32 to vector<8x128xf32>
    %31 = arith.subf %30, %29 : vector<8x128xf32>
    %32 = arith.mulf %14, %31 : vector<8x128xf32>
    %33 = arith.mulf %32, %31 : vector<8x128xf32>
    %c0_11 = arith.constant 0 : index
    %c0_12 = arith.constant 0 : index
    %34 = vector.load %arg5[%c0_11, %c0_12] : memref<1x128xf32, #tpu.memory_space<vmem>>, vector<1x128xf32>
    %cst_13 = arith.constant dense<0.000000e+00> : vector<128xf32>
    %35 = vector.multi_reduction <add>, %33, %cst_13 [0] : vector<8x128xf32> to vector<128xf32>
    %36 = vector.shape_cast %35 : vector<128xf32> to vector<1x128xf32>
    %37 = arith.addf %34, %36 : vector<1x128xf32>
    %c0_14 = arith.constant 0 : index
    %c0_15 = arith.constant 0 : index
    %38 = vector.load %arg5[%c0_14, %c0_15] : memref<1x128xf32, #tpu.memory_space<vmem>>, vector<1x128xf32>
    tpu.vector_store %arg5[%c0_14, %c0_15], %37 {strides = array<i32>} : memref<1x128xf32, #tpu.memory_space<vmem>>, vector<1x128xf32>,
    %c0_i32_16 = arith.constant 0 : i32
    %39 = arith.cmpi eq, %arg1, %c0_i32_16 : i32
    %40 = arith.extui %39 : i1 to i32
    %c0_i32_17 = arith.constant 0 : i32
    %41 = arith.cmpi ne, %40, %c0_i32_17 : i32
    scf.if %41 {
      %c0_18 = arith.constant 0 : index
      %c0_19 = arith.constant 0 : index
      %42 = vector.load %arg5[%c0_18, %c0_19] : memref<1x128xf32, #tpu.memory_space<vmem>>, vector<1x128xf32>
      %43 = vector.shape_cast %42 : vector<1x128xf32> to vector<1x1x128xf32>
      %c0_20 = arith.constant 0 : index
      %c0_21 = arith.constant 0 : index
      %c0_22 = arith.constant 0 : index
      %44 = vector.load %arg4[%c0_20, %c0_21, %c0_22] : memref<1x1x128xf32, #tpu.memory_space<vmem>>, vector<1x1x128xf32>
      tpu.vector_store %arg4[%c0_20, %c0_21, %c0_22], %43 {strides = array<i32>} : memref<1x1x128xf32, #tpu.memory_space<vmem>>, vector<1x1x128xf32>,
    } else {
    }
    return
  }
  func.func @transform_0(%arg0: i32, %arg1: i32) -> (i32, i32) {
    %c1_i32 = arith.constant 1 : i32
    %0 = arith.muli %arg0, %c1_i32 : i32
    %1 = arith.addi %0, %arg1 : i32
    %c0_i32 = arith.constant 0 : i32
    %c0_i32_0 = arith.constant 0 : i32
    return %1, %c0_i32 : i32, i32
  }
  func.func @transform_1(%arg0: i32, %arg1: i32) -> (i32, i32) {
    %c1_i32 = arith.constant 1 : i32
    %0 = arith.muli %arg0, %c1_i32 : i32
    %1 = arith.addi %0, %arg1 : i32
    %c0_i32 = arith.constant 0 : i32
    %c0_i32_0 = arith.constant 0 : i32
    return %1, %c0_i32 : i32, i32
  }
  func.func @transform_2(%arg0: i32, %arg1: i32) -> (i32, i32, i32) {
    %c0_i32 = arith.constant 0 : i32
    %c0_i32_0 = arith.constant 0 : i32
    %c0_i32_1 = arith.constant 0 : i32
    return %arg0, %c0_i32, %c0_i32_0 : i32, i32, i32
  }
}

</mosaic_0001>

<bundles_post_ra>
// kernel: tpu_custom_call.1
= control target key start
LH: loop header
LB: loop body
LE: loop exit
PB: predicated region body
PF: predicated region fallthrough
CT: control target
= control target key end

     0   :  { %7 = vsyncpa [#allocation4], 0  ;;  %s776_s0 = inlined_call_operand.hbm [shape: f32[16,128], index: 0, kind: input, shape index: {}]   ;;  %s777_s1 = inlined_call_operand.hbm [shape: f32[16,128], index: 1, kind: input, shape index: {}]   ;;  %s778_s2 = inlined_call_operand.hbm [shape: f32[2,1,128], index: 2, kind: output, shape index: {}]  }
   0x1   :  { %9 = vsyncpa [#allocation4 + $0x1], 0 }
   0x2   :  { %10 = vsyncpa [#allocation7], 0 }
   0x3   :  { %12 = vsyncpa [#allocation7 + $0x1], 0 }
   0x4   :  { %13 = vsyncpa [#allocation5], 0 }
   0x5   :  { %15 = vsyncpa [#allocation5 + $0x1], 0  ;;  %s647_s9 = smov 0   ;;  %s649_s10 = smov 0  }
   0x6   :  { %s651_s11 = smov 0   ;;  %s653_s12 = smov 0  }
   0x7   :  { %s655_s13 = smov 0   ;;  %s657_s14 = smov 0  }
   0x8 LB: > { %s396_s15 = sadd.s32 4294967295, %s629_s14   ;;  %s397_s16 = sadd.s32 4294967294, %s629_s14   ;;  %s629_s14 = sphi %s657_s14, %s21_s14   ;;  %s625_s13 = sphi %s655_s13, %s787_s13   ;;  %s621_s12 = sphi %s653_s12, %s786_s12   ;;  %s617_s11 = sphi %s651_s11, %s785_s11   ;;  %s613_s10 = sphi %s649_s10, %s784_s10   ;;  %s609_s9 = sphi %s647_s9, %s783_s9  }
   0x9   : > { %s33_s17 = sadd.s32 1, %s625_s13  ;;  %s42_s18 = sadd.s32 1, %s617_s11 }
   0xa   : > { %p35_p0 = scmp.ge.s32.totalorder %s33_s17, 2  ;;  %p49_p1 = scmp.ne.s32.totalorder %s617_s11, %s613_s10 }
   0xb   : > { %p50_p2 = scmp.eq.s32.totalorder %s629_s14, 0  ;;  %p55_p3 = scmp.ne.s32.totalorder %s613_s10, %s609_s9 }
   0xc   : > { %s789_s17 = smov (%p35_p0, %s33_s17), 0  ;;  %p56_p5 = scmp.eq.s32.totalorder %s396_s15, 0 }
   0xd   : > { %p688_p4 = por %p50_p2, %p49_p1  ;;  %s39_s20 = ssub.s32 %s625_s13, %s789_s17 }
   0xe   : > { %p107_p6 = scmp.eq.s32.totalorder %s396_s15, 1  ;;  %p40_p7 = scmp.eq.s32.totalorder %s39_s20, 0 }
   0xf   : > { %p694_p8 = por %p56_p5, %p55_p3  ;;  %p113_p10 = scmp.eq.s32.totalorder %s397_s16, 1 }
  0x10   : > { %p698_p9 = por %p107_p6, %p49_p1  ;;  %p399_p12 = scmp.ge.s32.totalorder %s629_s14, 2 }
  0x11   : > { %s703_s23 = scalar_select %p40_p7, %s617_s11, %s42_s18  }
  0x12   : > { %p705_p11 = por %p113_p10, %p55_p3  ;;  %p426_p13 = scmp.lt.s32.totalorder %s629_s14, 2 }
  0x13   : > { %s133_s25 = sand.u32 1, %s617_s11   ;;  %s401_s27 = sshll.u32 %s625_s13, 3 }
  0x14   : > { %s400_s26 = sshll.u32 %s133_s25, 3  ;;  %s142_s30 = scalar_lea.hbm %s776_s0, %s401_s27 }
  0x15   : > { %s137_s3 = scalar_lea.vmem [#allocation3], %s400_s26  ;;  %s144_s5 = sshll.u32 %s142_s30, 4  ;;  %s145_s5 = int_to_ptr.hbm [resolvable:$true] %s144_s5 }
  0x16   : > { %s146_s4 = sshll.u32 %s137_s3, 4  ;;  %p416_p0 = pnand %p426_p13, %p688_p4  ;;  %s147_s4 = int_to_ptr.vmem [resolvable:$true] %s146_s4 }
  0x17   : > { %p404_p1 = scmp.ge.s32.totalorder %s629_s14, 1  ;;  %p171_p2 = scmp.lt.s32.totalorder %s629_s14, 3 }
  0x18   : > { %s134_s6 = scalar_lea.sflag [#allocation4], %s133_s25  ;;  %s162_s15 = scalar_lea.hbm %s777_s1, %s401_s27 }
  0x19   : > { %418 = dma.hbm_to_vmem [thread:$0]  (!%p416_p0), %s145_s5, 128, %s147_s4, %s134_s6  }
  0x1a   : > { %p172_p3 = pnand %p404_p1, %p171_p2  ;;  %s157_s16 = scalar_lea.vmem [#allocation6], %s400_s26 }
  0x1b   : > { %s166_s18 = sshll.u32 %s157_s16, 4  ;;  %s164_s20 = sshll.u32 %s162_s15, 4  ;;  %s167_s18 = int_to_ptr.vmem [resolvable:$true] %s166_s18  ;;  %s165_s20 = int_to_ptr.hbm [resolvable:$true] %s164_s20 }
  0x1c   : > { %s154_s28 = scalar_lea.sflag [#allocation7], %s133_s25  ;;  %175 = sbr.rel (%p172_p3) target bundleno = 109 (0x6d), region = 28 }
  0x1d   : > { %421 = dma.hbm_to_vmem [thread:$0]  (!%p416_p0), %s165_s20, 128, %s167_s18, %s154_s28  }
  0x1e   : > { %s724_s19 = sand.u32 (!%p172_p3), 1, %s613_s10  }
  0x1f   : > { %s405_s29 = sshll.u32 (!%p172_p3), %s724_s19, 3  ;;  %s178_s30 = scalar_lea.sflag (!%p172_p3), [#allocation4], %s724_s19 }
  0x20   : > { %s181_s3 = scalar_lea.vmem (!%p172_p3), [#allocation3], %s405_s29 }
  0x21   : > { %596 = dma.done.wait (%p694_p8), %s178_s30, 128  }
  0x22   : > { %598 = vsyncadd (%p694_p8), %s178_s30, 4294967168  ;;  %s188_s26 = scalar_lea.sflag [#allocation7], %s724_s19  ;;  %s191_s25 = scalar_lea.vmem [#allocation6], %s405_s29 }
  0x23   : > { %600 = dma.done.wait (%p694_p8), %s188_s26, 128  }
  0x24   : > { %602 = vsyncadd (%p694_p8), %s188_s26, 4294967168  ;;  %v631_v0 = vmov 0.0   ;;  %v224_v1 = vld [vmem:[%s181_s3] sm:$0xff]  ;;  %v225_v19 = vld [vmem:[%s191_s25] sm:$0xff]  ;;  %s293_s4 = scalar_lea.hbm %s778_s2, %s621_s12  ;;  %s216_s5 = scalar_lea.vmem [#allocation8], %s724_s19 }
  0x25   : > { %223 = vst [vmem:[#allocation2] sm:$0x1] %v631_v0  ;;  %v226_v2 = vand.u32 2147483647, %v224_v1  ;;  %v230_v21 = vmax.f32 %v224_v1, 0.0  ;;  %v231_v22 = vmul.f32 %v225_v19, %v224_v1  ;;  %vm259_vm4 = vcmp.ge.f32.partialorder %v224_v1, 0.0 }
  0x26   : > { %v264_v27 = vsub.f32 1.0, %v225_v19  ;;  %s295_s6 = sshll.u32 %s216_s5, 4  ;;  %s297_s7 = sshll.u32 %s293_s4, 4  ;;  %s296_s6 = int_to_ptr.vmem [resolvable:$true] %s295_s6  ;;  %s298_s7 = int_to_ptr.hbm [resolvable:$true] %s297_s7 }
  0x27   : > { %v227_v3 = vsub.f32 0.0, %v226_v2  ;;  %v232_v29 = vsub.f32 %v230_v21, %v231_v22  ;;  %s285_s8 = scalar_lea.sflag [#allocation5], %s724_s19  ;;  %s557_s15 = sshra.s32 %s298_s7, 4  ;;  %s558_s15 = int_to_ptr.hbm [resolvable:$true] %s557_s15 }
  0x28   : > { %s559_s16 = scalar_lea.hbm %s558_s15, 1  ;;  %s563_s28 = scalar_lea.hbm %s778_s2, 2 }
  0x29   : > { %v228_v4 = vmul.f32 1.442695, %v227_v3  ;;  %p560_p4 = scmp.ne.s32.totalorder %s558_s15, %s559_s16  ;;  %p564_p7 = scmp.lt.s32.totalorder %s558_s15, %s778_s2 }
  0x2a   : > { %p565_p8 = scmp.lt.s32.totalorder %s563_s28, %s559_s16 }
  0x2b   : > { %477 = vpow2.f32 %v228_v4  ;;  %p561_p5 = pnand %p560_p4, %p698_p9 }
  0x2c   : > { %v270_v44 = vld [vmem:[#allocation2] sm:$0x1]  ;;  %p566_p10 = por %p565_p8, %p564_p7 }
  0x2d   : > { %p562_p6 = pneg %p561_p5 }
  0x2f   : > { %p567_p13 = pnand %p566_p10, %p562_p6 }
  0x31   : > { %v478_v5 = vpop.eup %477 }
  0x32   : > { %v233_v6 = vadd.f32 1.0, %v478_v5  ;;  %v236_v9 = vmul.f32 -0.5, %v478_v5  ;;  %v239_v18 = vand.u32 2147483647, %v478_v5 }
  0x34   : > { %479 = vrcp.f32 %v233_v6  ;;  %v255_v10 = vand.u32 2147483648, %v233_v6  ;;  %vm249_vm0 = vweird.f32 %v233_v6  ;;  %v253_v12 = vand.u32 2147483647, %v233_v6 }
  0x35   : > { %481 = vlog2.f32 %v233_v6  ;;  %v237_v15 = vadd.f32 1.0, %v236_v9  ;;  %vm240_vm5 = vcmp.lt.f32.partialorder %v239_v18, 0.0004427343 }
  0x36   : > { %v256_v14 = vor.u32 1.1754944e-38, %v255_v10  ;;  %vm254_vm3 = vcmp.eq.f32.partialorder %v253_v12, 8.507059e+37 }
  0x37   : > { %v238_v25 = vmul.f32 %v478_v5, %v237_v15 }
  0x3a   : > { %v480_v7 = vpop.eup %479 }
  0x3b   : > { %v245_v8 = vmul.f32 %v480_v7, %v233_v6  ;;  %vm250_vm1 = vweird.f32 %v480_v7  ;;  %v482_v17 = vpop.eup %481 }
  0x3c   : > { %vm251_vm2 = vmor %vm249_vm0, %vm250_vm1  ;;  %v235_v24 = vmul.f32 0.6931472, %v482_v17 }
  0x3d   : > { %v246_v11 = vsub.f32 1.0, %v245_v8 }
  0x3e   : > { %v241_v32 = vsel %vm240_vm5, %v238_v25, %v235_v24 }
  0x3f   : > { %v247_v13 = vmul.f32 %v480_v7, %v246_v11  ;;  %v242_v34 = vadd.f32 %v241_v32, %v232_v29 }
  0x41   : > { %v248_v16 = vadd.f32 %v480_v7, %v247_v13 }
  0x43   : > { %v252_v20 = vsel %vm251_vm2, %v480_v7, %v248_v16 }
  0x44   : > { %v257_v23 = vsel %vm254_vm3, %v256_v14, %v252_v20 }
  0x45   : > { %v260_v26 = vmul.f32 %v478_v5, %v257_v23 }
  0x47   : > { %v261_v28 = vsel %vm259_vm4, %v257_v23, %v260_v26 }
  0x48   : > { %v262_v30 = vmul.f32 %v261_v28, %v225_v19  ;;  %v263_v31 = vsub.f32 1.0, %v261_v28 }
  0x4a   : > { %v265_v33 = vmul.f32 %v264_v27, %v263_v31 }
  0x4c   : > { %v266_v35 = vadd.f32 %v265_v33, %v262_v30 }
  0x4e   : > { %v267_v36 = vsub.f32 1.0, %v266_v35 }
  0x50   : > { %v268_v37 = vmul.f32 %v267_v36, %v242_v34 }
  0x52   : > { %v269_v38 = vmul.f32 %v268_v37, %v267_v36 }
  0x54   : > { %v271_v39 = vrot.slane %v269_v38, 4 }
  0x56   : > { %v272_v40 = vadd.f32 %v271_v39, %v269_v38 }
  0x58   : > { %v273_v41 = vrot.slane %v272_v40, 2 }
  0x5a   : > { %v274_v42 = vadd.f32 %v273_v41, %v272_v40 }
  0x5c   : > { %v275_v43 = vrot.slane %v274_v42, 1 }
  0x5e   : > { %v276_v45 = vadd.f32 %v275_v43, %v274_v42 }
  0x60   : > { %v277_v46 = vadd.f32 %v276_v45, %v270_v44 }
  0x62   : > { %278 = vst [vmem:[#allocation2] sm:$0x1] %v277_v46 }
  0x69   : > { %v282_v47 = vld [vmem:[#allocation2] sm:$0x1] }
  0x6a   : > { %283 = vst [vmem:[%s216_s5] sm:$0x1] %v282_v47 }
  0x6b   : > { %570 = shalt.err (!%p567_p13)
}
  0x6c   : > { %413 = dma.vmem_to_hbm [thread:$0]  (%p698_p9), %s296_s6, 16, %s298_s7, %s285_s8  }
  0x6d PF: > { %s309_s19 = sand.u32 1, %s609_s9   ;;  %p423_p0 = pnand %p399_p12, %p705_p11 }
  0x6e   : > { %s310_s30 = scalar_lea.sflag [#allocation5], %s309_s19 }
  0x6f   : > { %p424_p1 = pneg %p423_p0 }
  0x71   : > { %604 = dma.done.wait (%p424_p1), %s310_s30, 16  }
  0x72   : > { %606 = vsyncadd (%p424_p1), %s310_s30, 4294967280  ;;  %s21_s14 = sadd.s32 1, %s629_s14   ;;  %s783_s9 = smov %s613_s10 }
  0x73   : > { %p18_p2 = scmp.ge.s32.totalorder %s21_s14, 4   ;;  %s784_s10 = smov %s617_s11 }
  0x74   : > { %s785_s11 = smov %s703_s23  ;;  %s786_s12 = smov %s625_s13 }
  0x75   : > { %s787_s13 = smov %s789_s17  ;;  %20 = sbr.rel (!%p18_p2) target bundleno = 8 (0x8), region = 94 }
  0x7a   :  { %315 = vsyncpa [#allocation4], 1 }
  0x7b   :  { %317 = vsyncpa [#allocation4 + $0x1], 1 }
  0x7c   :  { %318 = vsyncpa [#allocation7], 1 }
  0x7d   :  { %320 = vsyncpa [#allocation7 + $0x1], 1 }
  0x7e   :  { %321 = vsyncpa [#allocation5], 1 }
  0x7f   :  { %323 = vsyncpa [#allocation5 + $0x1], 1 }

</bundles_post_ra>
